<compile_context>
chip_gen: v5e
topology: v5e:2x2
jax: 0.10.0
libtpu: 0.0.40
codegen_flags: <defaults>
</compile_context>

<pallas_src>
import jax
import jax.numpy as jnp
from jax.experimental import pallas as pl
from jax.experimental.pallas import tpu as pltpu


# ----------------------------------------------------------------------------- kernel
def mcd_head_kernel(x_ref, w1_ref, b1_ref, w2_ref, b2_ref, w3_ref, b3_ref, out_ref):
    # x_ref: (TN, C, HW) — the backbone's native layout (NCHW reshaped).
    # AdaptiveAvgPool2d((1,1)) + Flatten == mean over the spatial (lane) axis.
    pooled = jnp.mean(x_ref[...], axis=2)                       # (TN, C)

    # Dropout(0.5) is identity in eval mode.
    # Linear1 + (folded) BatchNorm1d + ReLU
    h1 = jnp.dot(pooled, w1_ref[...], preferred_element_type=jnp.float32) + b1_ref[...]
    h1 = jnp.maximum(h1, 0.0)

    # Dropout(0.5) identity, Linear2 + (folded) BatchNorm1d + ReLU
    h2 = jnp.dot(h1, w2_ref[...], preferred_element_type=jnp.float32) + b2_ref[...]
    h2 = jnp.maximum(h2, 0.0)

    # Final Linear (padded to a lane-dense width; sliced back in the wrapper).
    out_ref[...] = jnp.dot(h2, w3_ref[...], preferred_element_type=jnp.float32) + b3_ref[...]


# ----------------------------------------------------------------------------- helpers
def _round_up(x, m):
    return (x + m - 1) // m * m


def _pad_axis(a, axis, target):
    pad = target - a.shape[axis]
    if pad == 0:
        return a
    widths = [(0, 0)] * a.ndim
    widths[axis] = (0, pad)
    return jnp.pad(a, widths)


def fold_bn(w, b, gamma, beta, running_mean, running_var, eps=1e-5):
    """Fold eval-mode BatchNorm1d into the preceding Linear (w laid out (in, out))."""
    s = gamma / jnp.sqrt(running_var + eps)                    # (out,)
    w_f = w * s[None, :]
    b_f = (b - running_mean) * s + beta
    return w_f, b_f


def _pick_tile_n(n, c, hw, bd_pad, nc_pad, budget_bytes=40 * 1024 * 1024):
    """Largest batch tile whose double-buffered working set fits the VMEM budget.

    Accounts for the (8, 128) sublane/lane padding of the VMEM tiles:
    the (TN, C, HW) x tile occupies TN * ceil8(C) * ceil128(HW) words.
    """
    c_sub = _round_up(c, 8)
    hw_lane = _round_up(hw, 128)
    w_bytes = (c_sub * bd_pad + bd_pad * bd_pad + bd_pad * nc_pad
               + 2 * 8 * bd_pad + 8 * nc_pad) * 4

    def need(tn):
        x_blk = tn * c_sub * hw_lane * 4
        o_blk = tn * nc_pad * 4
        return 2 * (x_blk + o_blk) + 2 * w_bytes     # double-buffered tiles + resident weights

    tn = 128
    while tn > 8 and need(tn) > budget_bytes:
        tn //= 2
    tn = max(8, min(tn, _round_up(n, 8)))            # don't over-tile tiny batches
    return tn, need(tn)


# ----------------------------------------------------------------------------- wrapper
@jax.jit
def image_classifier_head(x_nchw, params):
    """x_nchw: (N, C, H, W) float32; returns (N, num_classes) float32."""
    n, c, h, w = x_nchw.shape
    hw = h * w

    # NCHW -> (N, C, HW): a pure (contiguous) reshape, no HBM transpose pass.
    x = x_nchw.astype(jnp.float32).reshape(n, c, hw)

    # Fold eval-mode BatchNorm into the Linears.
    w1, b1 = fold_bn(params["w1"], params["b1"], params["bn1_gamma"],
                     params["bn1_beta"], params["bn1_mean"], params["bn1_var"])
    w2, b2 = fold_bn(params["w2"], params["b2"], params["bn2_gamma"],
                     params["bn2_beta"], params["bn2_mean"], params["bn2_var"])
    w3, b3 = params["w3"], params["b3"]

    bottleneck = w1.shape[1]
    num_classes = w3.shape[1]
    bd_pad = _round_up(bottleneck, 128)
    nc_pad = _round_up(num_classes, 128)

    # Zero-pad output-feature dims to lane-dense widths (padded columns/rows are
    # exact zeros, so results in the first `num_classes` columns are unchanged).
    w1p = _pad_axis(w1, 1, bd_pad)
    b1p = _pad_axis(b1, 0, bd_pad).reshape(1, bd_pad)
    w2p = _pad_axis(_pad_axis(w2, 0, bd_pad), 1, bd_pad)
    b2p = _pad_axis(b2, 0, bd_pad).reshape(1, bd_pad)
    w3p = _pad_axis(_pad_axis(w3, 0, bd_pad), 1, nc_pad)
    b3p = _pad_axis(b3, 0, nc_pad).reshape(1, nc_pad)

    # Batch tiling: auto-sized to fit VMEM (v7x: 64 MiB/TC) with double-buffering.
    tn, need = _pick_tile_n(n, c, hw, bd_pad, nc_pad)
    n_pad = _round_up(n, tn)
    x_p = _pad_axis(x, 0, n_pad)
    vmem_limit = int(min(max(need + (2 << 20), 16 << 20), 56 << 20))

    # TODO(synk): for very large C * HW backbones where even one (TN, C, HW) tile
    # overflows VMEM at TN=8, add a second "arbitrary" grid axis over C with a
    # pl.when-guarded accumulator for the pool + first matmul.
    out = pl.pallas_call(
        mcd_head_kernel,
        out_shape=jax.ShapeDtypeStruct((n_pad, nc_pad), jnp.float32),
        grid=(n_pad // tn,),
        in_specs=[
            pl.BlockSpec((tn, c, hw), lambda i: (i, 0, 0)),        # x: streamed per tile
            pl.BlockSpec((c, bd_pad), lambda i: (0, 0)),           # weights/biases: resident
            pl.BlockSpec((1, bd_pad), lambda i: (0, 0)),
            pl.BlockSpec((bd_pad, bd_pad), lambda i: (0, 0)),
            pl.BlockSpec((1, bd_pad), lambda i: (0, 0)),
            pl.BlockSpec((bd_pad, nc_pad), lambda i: (0, 0)),
            pl.BlockSpec((1, nc_pad), lambda i: (0, 0)),
        ],
        out_specs=pl.BlockSpec((tn, nc_pad), lambda i: (i, 0)),
        compiler_params=pltpu.CompilerParams(
            dimension_semantics=("parallel",),
            vmem_limit_bytes=vmem_limit,
        ),
    )(x_p, w1p, b1p, w2p, b2p, w3p, b3p)

    return out[:n, :num_classes]


# ----------------------------------------------------------------------------- params / reference
def make_params(key, in_features, num_classes, bottleneck_dim):
    ks = jax.random.split(key, 8)

    def lin(k, fan_in, fan_out):
        bound = 1.0 / jnp.sqrt(fan_in)
        kw, kb = jax.random.split(k)
        w = jax.random.uniform(kw, (fan_in, fan_out), jnp.float32, -bound, bound)
        b = jax.random.uniform(kb, (fan_out,), jnp.float32, -bound, bound)
        return w, b

    w1, b1 = lin(ks[0], in_features, bottleneck_dim)
    w2, b2 = lin(ks[1], bottleneck_dim, bottleneck_dim)
    w3, b3 = lin(ks[2], bottleneck_dim, num_classes)
    return dict(
        w1=w1, b1=b1,
        bn1_gamma=1.0 + 0.1 * jax.random.normal(ks[3], (bottleneck_dim,)),
        bn1_beta=0.05 * jax.random.normal(ks[4], (bottleneck_dim,)),
        bn1_mean=0.02 * jax.random.normal(ks[5], (bottleneck_dim,)),
        bn1_var=jnp.abs(1.0 + 0.1 * jax.random.normal(ks[6], (bottleneck_dim,))),
        w2=w2, b2=b2,
        bn2_gamma=jnp.ones((bottleneck_dim,), jnp.float32),
        bn2_beta=jnp.zeros((bottleneck_dim,), jnp.float32),
        bn2_mean=jnp.zeros((bottleneck_dim,), jnp.float32),
        bn2_var=jnp.ones((bottleneck_dim,), jnp.float32),
        w3=w3, b3=b3,
    )


def reference_forward(x_nchw, params, eps=1e-5):
    """Pure-JAX reference mirroring the PyTorch module in eval mode (unfolded BN)."""
    pooled = jnp.mean(x_nchw, axis=(2, 3))

    def bn(x, g, b, m, v):
        return (x - m) / jnp.sqrt(v + eps) * g + b

    h1 = jnp.maximum(bn(pooled @ params["w1"] + params["b1"],
                        params["bn1_gamma"], params["bn1_beta"],
                        params["bn1_mean"], params["bn1_var"]), 0.0)
    h2 = jnp.maximum(bn(h1 @ params["w2"] + params["b2"],
                        params["bn2_gamma"], params["bn2_beta"],
                        params["bn2_mean"], params["bn2_var"]), 0.0)
    return h2 @ params["w3"] + params["b3"]


if __name__ == "__main__":
    # Small demo shapes: batch=2, in_features(C)=4, spatial=16x16,
    # bottleneck_dim=32, num_classes=3. (Benchmark at production sizes with
    # xprof; at this scale everything is launch overhead.)
    key = jax.random.PRNGKey(0)
    kx, kp = jax.random.split(key)
    N, C, H, W = 2, 4, 16, 16
    BOTTLENECK, NUM_CLASSES = 32, 3

    x = jax.random.normal(kx, (N, C, H, W), jnp.float32)
    params = make_params(kp, C, NUM_CLASSES, BOTTLENECK)

    out = image_classifier_head(x, params)
    out = jax.block_until_ready(out)

    ref = reference_forward(x, params)
    assert out.shape == (N, NUM_CLASSES), out.shape
    assert jnp.allclose(out, ref, atol=1e-4, rtol=1e-4), (out, ref)
    print("KERNEL_OK")
</pallas_src>

<mosaic_0001>
module attributes {stable_mosaic.version = 11 : i64} {
  func.func @mcd_head_kernel(%arg0: i32, %arg1: memref<8x4x256xf32, #tpu.memory_space<vmem>>, %arg2: memref<4x128xf32, #tpu.memory_space<vmem>>, %arg3: memref<1x128xf32, #tpu.memory_space<vmem>>, %arg4: memref<128x128xf32, #tpu.memory_space<vmem>>, %arg5: memref<1x128xf32, #tpu.memory_space<vmem>>, %arg6: memref<128x128xf32, #tpu.memory_space<vmem>>, %arg7: memref<1x128xf32, #tpu.memory_space<vmem>>, %arg8: memref<8x128xf32, #tpu.memory_space<vmem>>) attributes {dimension_semantics = [#tpu.dimension_semantics<parallel>], iteration_bounds = array<i64: 1>, scalar_prefetch = 0 : i64, scratch_operands = 0 : i64, tpu.core_type = #tpu.core_type<tc>, window_params = [{transform_indices = @transform_0, window_bounds = array<i64: 8, 4, 256>}, {pipeline_mode = #tpu.pipeline_mode<synchronous>, transform_indices = @transform_1, window_bounds = array<i64: 4, 128>}, {pipeline_mode = #tpu.pipeline_mode<synchronous>, transform_indices = @transform_2, window_bounds = array<i64: 1, 128>}, {pipeline_mode = #tpu.pipeline_mode<synchronous>, transform_indices = @transform_3, window_bounds = array<i64: 128, 128>}, {pipeline_mode = #tpu.pipeline_mode<synchronous>, transform_indices = @transform_4, window_bounds = array<i64: 1, 128>}, {pipeline_mode = #tpu.pipeline_mode<synchronous>, transform_indices = @transform_5, window_bounds = array<i64: 128, 128>}, {pipeline_mode = #tpu.pipeline_mode<synchronous>, transform_indices = @transform_6, window_bounds = array<i64: 1, 128>}, {transform_indices = @transform_7, window_bounds = array<i64: 8, 128>}]} {
    %c0 = arith.constant 0 : index
    %c0_0 = arith.constant 0 : index
    %c0_1 = arith.constant 0 : index
    %0 = vector.load %arg1[%c0, %c0_0, %c0_1] : memref<8x4x256xf32, #tpu.memory_space<vmem>>, vector<8x4x256xf32>
    %cst = arith.constant dense<0.000000e+00> : vector<8x4xf32>
    %1 = vector.multi_reduction <add>, %0, %cst [2] : vector<8x4x256xf32> to vector<8x4xf32>
    %cst_2 = arith.constant 2.560000e+02 : f32
    %2 = vector.broadcast %cst_2 : f32 to vector<8x4xf32>
    %3 = arith.divf %1, %2 : vector<8x4xf32>
    %c0_3 = arith.constant 0 : index
    %c0_4 = arith.constant 0 : index
    %4 = vector.load %arg2[%c0_3, %c0_4] : memref<4x128xf32, #tpu.memory_space<vmem>>, vector<4x128xf32>
    %cst_5 = arith.constant dense<0.000000e+00> : vector<8x128xf32>
    %5 = tpu.matmul %3, %4, %cst_5 {dimension_numbers = #tpu.dot_dimension_numbers<[1], [0], [0], [1], [0, 0, 1, 1], [], []>} : vector<8x4xf32>, vector<4x128xf32>, vector<8x128xf32> -> vector<8x128xf32>
    %c0_6 = arith.constant 0 : index
    %c0_7 = arith.constant 0 : index
    %6 = vector.load %arg3[%c0_6, %c0_7] : memref<1x128xf32, #tpu.memory_space<vmem>>, vector<1x128xf32>
    %7 = vector.broadcast %6 : vector<1x128xf32> to vector<8x128xf32>
    %8 = arith.addf %5, %7 : vector<8x128xf32>
    %cst_8 = arith.constant 0.000000e+00 : f32
    %9 = vector.broadcast %cst_8 : f32 to vector<8x128xf32>
    %10 = arith.maximumf %8, %9 : vector<8x128xf32>
    %c0_9 = arith.constant 0 : index
    %c0_10 = arith.constant 0 : index
    %11 = vector.load %arg4[%c0_9, %c0_10] : memref<128x128xf32, #tpu.memory_space<vmem>>, vector<128x128xf32>
    %cst_11 = arith.constant dense<0.000000e+00> : vector<8x128xf32>
    %12 = tpu.matmul %10, %11, %cst_11 {dimension_numbers = #tpu.dot_dimension_numbers<[1], [0], [0], [1], [0, 0, 1, 1], [], []>} : vector<8x128xf32>, vector<128x128xf32>, vector<8x128xf32> -> vector<8x128xf32>
    %c0_12 = arith.constant 0 : index
    %c0_13 = arith.constant 0 : index
    %13 = vector.load %arg5[%c0_12, %c0_13] : memref<1x128xf32, #tpu.memory_space<vmem>>, vector<1x128xf32>
    %14 = vector.broadcast %13 : vector<1x128xf32> to vector<8x128xf32>
    %15 = arith.addf %12, %14 : vector<8x128xf32>
    %cst_14 = arith.constant 0.000000e+00 : f32
    %16 = vector.broadcast %cst_14 : f32 to vector<8x128xf32>
    %17 = arith.maximumf %15, %16 : vector<8x128xf32>
    %c0_15 = arith.constant 0 : index
    %c0_16 = arith.constant 0 : index
    %18 = vector.load %arg6[%c0_15, %c0_16] : memref<128x128xf32, #tpu.memory_space<vmem>>, vector<128x128xf32>
    %cst_17 = arith.constant dense<0.000000e+00> : vector<8x128xf32>
    %19 = tpu.matmul %17, %18, %cst_17 {dimension_numbers = #tpu.dot_dimension_numbers<[1], [0], [0], [1], [0, 0, 1, 1], [], []>} : vector<8x128xf32>, vector<128x128xf32>, vector<8x128xf32> -> vector<8x128xf32>
    %c0_18 = arith.constant 0 : index
    %c0_19 = arith.constant 0 : index
    %20 = vector.load %arg7[%c0_18, %c0_19] : memref<1x128xf32, #tpu.memory_space<vmem>>, vector<1x128xf32>
    %21 = vector.broadcast %20 : vector<1x128xf32> to vector<8x128xf32>
    %22 = arith.addf %19, %21 : vector<8x128xf32>
    %c0_20 = arith.constant 0 : index
    %c0_21 = arith.constant 0 : index
    %23 = vector.load %arg8[%c0_20, %c0_21] : memref<8x128xf32, #tpu.memory_space<vmem>>, vector<8x128xf32>
    tpu.vector_store %arg8[%c0_20, %c0_21], %22 {strides = array<i32>} : memref<8x128xf32, #tpu.memory_space<vmem>>, vector<8x128xf32>,
    return
  }
  func.func @transform_0(%arg0: i32) -> (i32, i32, i32) {
    %c0_i32 = arith.constant 0 : i32
    %c0_i32_0 = arith.constant 0 : i32
    %c0_i32_1 = arith.constant 0 : i32
    return %arg0, %c0_i32, %c0_i32_0 : i32, i32, i32
  }
  func.func @transform_1(%arg0: i32) -> (i32, i32) {
    %c0_i32 = arith.constant 0 : i32
    %c0_i32_0 = arith.constant 0 : i32
    %c0_i32_1 = arith.constant 0 : i32
    return %c0_i32, %c0_i32_0 : i32, i32
  }
  func.func @transform_2(%arg0: i32) -> (i32, i32) {
    %c0_i32 = arith.constant 0 : i32
    %c0_i32_0 = arith.constant 0 : i32
    %c0_i32_1 = arith.constant 0 : i32
    return %c0_i32, %c0_i32_0 : i32, i32
  }
  func.func @transform_3(%arg0: i32) -> (i32, i32) {
    %c0_i32 = arith.constant 0 : i32
    %c0_i32_0 = arith.constant 0 : i32
    %c0_i32_1 = arith.constant 0 : i32
    return %c0_i32, %c0_i32_0 : i32, i32
  }
  func.func @transform_4(%arg0: i32) -> (i32, i32) {
    %c0_i32 = arith.constant 0 : i32
    %c0_i32_0 = arith.constant 0 : i32
    %c0_i32_1 = arith.constant 0 : i32
    return %c0_i32, %c0_i32_0 : i32, i32
  }
  func.func @transform_5(%arg0: i32) -> (i32, i32) {
    %c0_i32 = arith.constant 0 : i32
    %c0_i32_0 = arith.constant 0 : i32
    %c0_i32_1 = arith.constant 0 : i32
    return %c0_i32, %c0_i32_0 : i32, i32
  }
  func.func @transform_6(%arg0: i32) -> (i32, i32) {
    %c0_i32 = arith.constant 0 : i32
    %c0_i32_0 = arith.constant 0 : i32
    %c0_i32_1 = arith.constant 0 : i32
    return %c0_i32, %c0_i32_0 : i32, i32
  }
  func.func @transform_7(%arg0: i32) -> (i32, i32) {
    %c0_i32 = arith.constant 0 : i32
    %c0_i32_0 = arith.constant 0 : i32
    return %arg0, %c0_i32 : i32, i32
  }
}

</mosaic_0001>

<bundles_post_ra>
// kernel: image_classifier_head.1
= control target key start
LH: loop header
LB: loop body
LE: loop exit
PB: predicated region body
PF: predicated region fallthrough
CT: control target
= control target key end

     0   :  { %vm85_vm0 = vcmask 1043456   ;;  %v299_v48 = vmov 256.0   ;;  %vm164_vm2 = vcmask 1041409   ;;  %vm166_vm3 = vcmask 1042434   ;;  %s492_s0 = inlined_call_operand.vmem [shape: f32[8,4,256], index: 0, kind: input, shape index: {}]   ;;  %s493_s2 = inlined_call_operand.vmem [shape: f32[1,128], index: 2, kind: input, shape index: {}]   ;;  %s494_s1 = inlined_call_operand.vmem [shape: f32[4,128], index: 1, kind: input, shape index: {}]   ;;  %s495_s3 = inlined_call_operand.vmem [shape: f32[128,128], index: 3, kind: input, shape index: {}]   ;;  %s496_s4 = inlined_call_operand.vmem [shape: f32[1,128], index: 4, kind: input, shape index: {}]   ;;  %s497_s5 = inlined_call_operand.vmem [shape: f32[128,128], index: 5, kind: input, shape index: {}]   ;;  %s498_s6 = inlined_call_operand.vmem [shape: f32[1,128], index: 6, kind: input, shape index: {}]   ;;  %s499_s7 = inlined_call_operand.vmem [shape: f32[8,128], index: 7, kind: output, shape index: {}]  }
   0x1   :  { %v26_v0 = vld [vmem:[%s492_s0] sm:$0xff]  ;;  %v28_v1 = vld [vmem:[%s492_s0 + $0x10] sm:$0xff]  ;;  %v27_v2 = vld [vmem:[%s492_s0 + $0x8] sm:$0xff]  ;;  %297 = vrcp.f32 %v299_v48  ;;  %vm168_vm4 = vcmask 1043459   ;;  %vm170_vm5 = vcmask 1044484   ;;  %vm172_vm6 = vcmask 1045509  }
   0x2   :  { %42 = vst [vmem:[#allocation1] ss:$2 sm:$0xff] %v26_v0  ;;  %v29_v3 = vld [vmem:[%s492_s0 + $0x18] sm:$0xff]  ;;  %v30_v4 = vld [vmem:[%s492_s0 + $0x20] sm:$0xff]  ;;  %v32_v5 = vld [vmem:[%s492_s0 + $0x30] sm:$0xff]  ;;  %v154_v0 = vlaneseq  ;;  %vm174_vm7 = vcmask 1046534  }
   0x3   :  { %50 = vst [vmem:[#allocation1 + $0x20] ss:$2 sm:$0xff] %v28_v1  ;;  %v31_v10 = vld [vmem:[%s492_s0 + $0x28] sm:$0xff]  ;;  %v33_v16 = vld [vmem:[%s492_s0 + $0x38] sm:$0xff]  ;;  %v141_v51 = vld [vmem:[%s494_s1] sm:$0xf] }
   0x4   :  { %46 = vst [vmem:[#allocation1 + $0x10] ss:$2 sm:$0xff] %v27_v2  ;;  %291 = vmatpush.msk.msra.mxu0 %vm85_vm0, %v141_v51  ;;  %v220_v53 = vld [vmem:[%s495_s3 + $0x78] sm:$0xff]  ;;  %v219_v54 = vld [vmem:[%s495_s3 + $0x70] sm:$0xff]  ;;  %v218_v55 = vld [vmem:[%s495_s3 + $0x68] sm:$0xff]  ;;  %vm176_vm8 = vcmask 1047559  }
   0x5   :  { %54 = vst [vmem:[#allocation1 + $0x30] ss:$2 sm:$0xff] %v29_v3  ;;  %225 = vmatpush.msra.mxu1 %v220_v53  ;;  %v217_v57 = vld [vmem:[%s495_s3 + $0x60] sm:$0xff]  ;;  %v216_v58 = vld [vmem:[%s495_s3 + $0x58] sm:$0xff]  ;;  %v215_v61 = vld [vmem:[%s495_s3 + $0x50] sm:$0xff]  ;;  %vm178_vm9 = vcmask 31744  }
   0x6   :  { %v214_v63 = vld [vmem:[%s495_s3 + $0x48] sm:$0xff]  ;;  %v213_v2 = vld [vmem:[%s495_s3 + $0x40] sm:$0xff]  ;;  %v212_v3 = vld [vmem:[%s495_s3 + $0x38] sm:$0xff] }
   0x7   :  { %v298_v49 = vpop.eup %297  ;;  %226 = vmatpush.msra.mxu1 %v219_v54  ;;  %v254_v48 = vld [vmem:[%s497_s5 + $0x40] sm:$0xff]  ;;  %v251_v51 = vld [vmem:[%s497_s5 + $0x28] sm:$0xff]  ;;  %v249_v53 = vld [vmem:[%s497_s5 + $0x18] sm:$0xff] }
   0x8   :  { %v127_v50 = vmul.f32 256.0, %v298_v49  ;;  %vm131_vm1 = vweird.f32 %v298_v49  ;;  %v294_v54 = vld [vmem:[%s493_s2] ss:$0 sm:$0xff] }
   0x9   :  { %v43_v6 = vld.sshfl [vmem:[#allocation1] sm:$0xff pattern:$0x75316420]  ;;  %v44_v7 = vld.sshfl [vmem:[#allocation1 + $0x8] sm:$0xff pattern:$0x75316420]  ;;  %227 = vmatpush.msra.mxu1 %v218_v55 }
   0xa   :  { %v86_v8 = vsel %vm85_vm0, %v43_v6, 0.0  ;;  %v87_v9 = vsel %vm85_vm0, %v44_v7, 0.0  ;;  %57 = vst [vmem:[#allocation1] ss:$2 sm:$0xff] %v30_v4  ;;  %v128_v52 = vsub.f32 1.0, %v127_v50  ;;  %v155_v4 = vand.u32 127, %v154_v0 }
   0xb   :  { %v88_v11 = vadd.f32 %v87_v9, %v86_v8  ;;  %v51_v12 = vld.sshfl [vmem:[#allocation1 + $0x20] sm:$0xff pattern:$0x75316420]  ;;  %v52_v13 = vld.sshfl [vmem:[#allocation1 + $0x28] sm:$0xff pattern:$0x75316420]  ;;  %228 = vmatpush.msra.mxu1 %v217_v57 }
   0xc   :  { %v96_v14 = vsel %vm85_vm0, %v51_v12, 0.0  ;;  %v97_v15 = vsel %vm85_vm0, %v52_v13, 0.0  ;;  %63 = vst [vmem:[#allocation1 + $0x20] ss:$2 sm:$0xff] %v32_v5  ;;  %v129_v56 = vmul.f32 %v298_v49, %v128_v52  ;;  %v211_v9 = vld [vmem:[%s495_s3 + $0x30] sm:$0xff]  ;;  %v210_v12 = vld [vmem:[%s495_s3 + $0x28] sm:$0xff] }
   0xd   :  { %89 = vadd.xlane.f32.xlu0 %v88_v11  ;;  %v98_v17 = vadd.f32 %v97_v15, %v96_v14  ;;  %v47_v18 = vld.sshfl [vmem:[#allocation1 + $0x10] sm:$0xff pattern:$0x75316420]  ;;  %v48_v19 = vld.sshfl [vmem:[#allocation1 + $0x18] sm:$0xff pattern:$0x75316420]  ;;  %229 = vmatpush.msra.mxu1 %v216_v58 }
   0xe   :  { %60 = vst [vmem:[#allocation1 + $0x10] ss:$2 sm:$0xff] %v31_v10  ;;  %v91_v20 = vsel %vm85_vm0, %v47_v18, 0.0  ;;  %v92_v21 = vsel %vm85_vm0, %v48_v19, 0.0  ;;  %v130_v59 = vadd.f32 %v298_v49, %v129_v56  ;;  %v252_v50 = vld [vmem:[%s497_s5 + $0x30] sm:$0xff]  ;;  %v250_v52 = vld [vmem:[%s497_s5 + $0x20] sm:$0xff] }
   0xf   :  { %99 = vadd.xlane.f32.xlu1 %v98_v17  ;;  %v55_v22 = vld.sshfl [vmem:[#allocation1 + $0x30] sm:$0xff pattern:$0x75316420]  ;;  %v56_v23 = vld.sshfl [vmem:[#allocation1 + $0x38] sm:$0xff pattern:$0x75316420]  ;;  %v93_v26 = vadd.f32 %v92_v21, %v91_v20  ;;  %230 = vmatpush.msra.mxu1 %v215_v61 }
  0x10   :  { %66 = vst [vmem:[#allocation1 + $0x30] ss:$2 sm:$0xff] %v33_v16  ;;  %v101_v24 = vsel %vm85_vm0, %v55_v22, 0.0  ;;  %v102_v25 = vsel %vm85_vm0, %v56_v23, 0.0  ;;  %v132_v1 = vsel %vm131_vm1, %v298_v49, %v130_v59  ;;  %v209_v17 = vld [vmem:[%s495_s3 + $0x20] sm:$0xff]  ;;  %v208_v22 = vld [vmem:[%s495_s3 + $0x18] sm:$0xff] }
  0x11   :  { %v58_v27 = vld.sshfl [vmem:[#allocation1] sm:$0xff pattern:$0x75316420]  ;;  %v59_v28 = vld.sshfl [vmem:[#allocation1 + $0x8] sm:$0xff pattern:$0x75316420]  ;;  %v103_v32 = vadd.f32 %v102_v25, %v101_v24  ;;  %231 = vmatpush.msra.mxu1 %v214_v63 }
  0x12   :  { %v106_v29 = vsel %vm85_vm0, %v58_v27, 0.0  ;;  %v107_v30 = vsel %vm85_vm0, %v59_v28, 0.0  ;;  %v253_v49 = vld [vmem:[%s497_s5 + $0x38] sm:$0xff]  ;;  %v248_v58 = vld [vmem:[%s497_s5 + $0x10] sm:$0xff]  ;;  %v247_v59 = vld [vmem:[%s497_s5 + $0x8] sm:$0xff] }
  0x13   :  { %v108_v31 = vadd.f32 %v107_v30, %v106_v29  ;;  %v64_v33 = vld.sshfl [vmem:[#allocation1 + $0x20] sm:$0xff pattern:$0x75316420]  ;;  %v65_v34 = vld.sshfl [vmem:[#allocation1 + $0x28] sm:$0xff pattern:$0x75316420]  ;;  %232 = vmatpush.msra.mxu1 %v213_v2 }
  0x14   :  { %v116_v39 = vsel %vm85_vm0, %v64_v33, 0.0  ;;  %v117_v40 = vsel %vm85_vm0, %v65_v34, 0.0  ;;  %v295_v61 = vld [vmem:[%s496_s4] ss:$0 sm:$0xff] }
  0x15   :  { %94 = vadd.xlane.f32.xlu0 %v93_v26  ;;  %109 = vadd.xlane.f32.xlu2 %v108_v31  ;;  %v61_v35 = vld.sshfl [vmem:[#allocation1 + $0x10] sm:$0xff pattern:$0x75316420]  ;;  %v62_v36 = vld.sshfl [vmem:[#allocation1 + $0x18] sm:$0xff pattern:$0x75316420]  ;;  %v118_v46 = vadd.f32 %v117_v40, %v116_v39 }
  0x16   :  { %v111_v37 = vsel %vm85_vm0, %v61_v35, 0.0  ;;  %v112_v38 = vsel %vm85_vm0, %v62_v36, 0.0  ;;  %233 = vmatpush.msra.mxu1 %v212_v3  ;;  %v206_v39 = vld [vmem:[%s495_s3 + $0x8] sm:$0xff]  ;;  %v205_v40 = vld [vmem:[%s495_s3] sm:$0xff] }
  0x17   :  { %104 = vadd.xlane.f32.xlu1 %v103_v32  ;;  %v67_v41 = vld.sshfl [vmem:[#allocation1 + $0x30] sm:$0xff pattern:$0x75316420]  ;;  %v68_v42 = vld.sshfl [vmem:[#allocation1 + $0x38] sm:$0xff pattern:$0x75316420]  ;;  %v113_v45 = vadd.f32 %v112_v38, %v111_v37 }
  0x18   :  { %v121_v43 = vsel %vm85_vm0, %v67_v41, 0.0  ;;  %v122_v44 = vsel %vm85_vm0, %v68_v42, 0.0  ;;  %234 = vmatpush.msra.mxu1 %v211_v9  ;;  %v207_v38 = vld [vmem:[%s495_s3 + $0x10] sm:$0xff]  ;;  %v261_v41 = vld [vmem:[%s497_s5 + $0x78] sm:$0xff] }
  0x19   :  { %v123_v47 = vadd.f32 %v122_v44, %v121_v43  ;;  %v260_v42 = vld [vmem:[%s497_s5 + $0x70] sm:$0xff]  ;;  %266 = vmatpush.msra.mxu2 %v261_v41  ;;  %v259_v43 = vld [vmem:[%s497_s5 + $0x68] sm:$0xff]  ;;  %v258_v44 = vld [vmem:[%s497_s5 + $0x60] sm:$0xff] }
  0x1a   :  { %235 = vmatpush.msra.mxu1 %v210_v12 }
  0x1b   :  { %267 = vmatpush.msra.mxu2 %v260_v42 }
  0x1c   :  { %236 = vmatpush.msra.mxu1 %v209_v17 }
  0x1d   :  { %114 = vadd.xlane.f32.xlu2 %v113_v45  ;;  %119 = vadd.xlane.f32.xlu0 %v118_v46  ;;  %v257_v45 = vld [vmem:[%s497_s5 + $0x58] sm:$0xff]  ;;  %v256_v46 = vld [vmem:[%s497_s5 + $0x50] sm:$0xff] }
  0x1e   :  { %237 = vmatpush.msra.mxu1 %v208_v22  ;;  %268 = vmatpush.msra.mxu2 %v259_v43 }
  0x1f   :  { %124 = vadd.xlane.f32.xlu1 %v123_v47  ;;  %v255_v47 = vld [vmem:[%s497_s5 + $0x48] sm:$0xff] }
  0x20   :  { %238 = vmatpush.msra.mxu1 %v207_v38  ;;  %269 = vmatpush.msra.mxu2 %v258_v44 }
  0x22   :  { %239 = vmatpush.msra.mxu1 %v206_v39  ;;  %270 = vmatpush.msra.mxu2 %v257_v45 }
  0x24   :  { %240 = vmatpush.msra.mxu1 %v205_v40  ;;  %271 = vmatpush.msra.mxu2 %v256_v46 }
  0x26   :  { %272 = vmatpush.msra.mxu2 %v255_v47 }
  0x28   :  { %273 = vmatpush.msra.mxu2 %v254_v48 }
  0x2a   :  { %274 = vmatpush.msra.mxu2 %v253_v49 }
  0x2c   :  { %275 = vmatpush.msra.mxu2 %v252_v50 }
  0x2e   :  { %276 = vmatpush.msra.mxu2 %v251_v51 }
  0x30   :  { %277 = vmatpush.msra.mxu2 %v250_v52 }
  0x32   :  { %278 = vmatpush.msra.mxu2 %v249_v53 }
  0x34   :  { %279 = vmatpush.msra.mxu2 %v248_v58 }
  0x36   :  { %280 = vmatpush.msra.mxu2 %v247_v59 }
  0x80   :  { %v90_v60 = vpop.xlane.xlu0 %89 }
  0x81   :  { %v133_v5 = vmul.f32 %v132_v1, %v90_v60  ;;  %v246_v60 = vld [vmem:[%s497_s5] sm:$0xff] }
  0x82   :  { %v100_v62 = vpop.xlane.xlu1 %99  ;;  %281 = vmatpush.msra.mxu2 %v246_v60 }
  0x83   :  { %v135_v6 = vmul.f32 %v132_v1, %v100_v62  ;;  %v156_v13 = vperm.slane %v133_v5, %v155_v4 }
  0x85   :  { %v158_v16 = vperm.slane %v135_v6, %v155_v4 }
  0x88   :  { %v95_v7 = vpop.xlane.xlu0 %94  ;;  %v110_v8 = vpop.xlane.xlu2 %109 }
  0x89   :  { %v134_v10 = vmul.f32 %v132_v1, %v95_v7  ;;  %v137_v20 = vmul.f32 %v132_v1, %v110_v8 }
  0x8a   :  { %v105_v11 = vpop.xlane.xlu1 %104 }
  0x8b   :  { %v157_v14 = vperm.slane %v134_v10, %v155_v4  ;;  %v136_v15 = vmul.f32 %v132_v1, %v105_v11  ;;  %v160_v28 = vperm.slane %v137_v20, %v155_v4 }
  0x8d   :  { %v165_v18 = vsel %vm164_vm2, %v157_v14, %v156_v13  ;;  %v159_v19 = vperm.slane %v136_v15, %v155_v4 }
  0x8e   :  { %v167_v21 = vsel %vm166_vm3, %v158_v16, %v165_v18 }
  0x8f   :  { %v169_v25 = vsel %vm168_vm4, %v159_v19, %v167_v21 }
  0x90   :  { %v115_v23 = vpop.xlane.xlu2 %114  ;;  %v120_v24 = vpop.xlane.xlu0 %119  ;;  %v171_v33 = vsel %vm170_vm5, %v160_v28, %v169_v25 }
  0x91   :  { %v138_v26 = vmul.f32 %v132_v1, %v115_v23  ;;  %v139_v27 = vmul.f32 %v132_v1, %v120_v24 }
  0x92   :  { %v125_v29 = vpop.xlane.xlu1 %124 }
  0x93   :  { %v161_v30 = vperm.slane %v138_v26, %v155_v4  ;;  %v162_v31 = vperm.slane %v139_v27, %v155_v4  ;;  %v140_v32 = vmul.f32 %v132_v1, %v125_v29  ;;  %v296_v1 = vld [vmem:[%s498_s6] ss:$0 sm:$0xff] }
  0x95   :  { %v163_v34 = vperm.slane %v140_v32, %v155_v4  ;;  %v173_v35 = vsel %vm172_vm6, %v161_v30, %v171_v33 }
  0x96   :  { %v175_v36 = vsel %vm174_vm7, %v162_v31, %v173_v35 }
  0x97   :  { %v177_v37 = vsel %vm176_vm8, %v163_v34, %v175_v36 }
  0x98   :  { %292 = vmatmul.msk.f32.vlgmr.msra.gmra.mxu0 %vm178_vm9, %v177_v37 }
 0x115   :  { %v201_v55 = vpop.f32.mrf.mxu0 }
 0x116   :  { %v202_v56 = vadd.f32 %v294_v54, %v201_v55 }
 0x118   :  { %v204_v57 = vmax.f32 %v202_v56, 0.0 }
 0x11a   :  { %241 = vmatmul.f32.vlgmr.msra.gmra.mxu1 %v204_v57 }
 0x197   :  { %v242_v62 = vpop.f32.mrf.mxu1 }
 0x198   :  { %v243_v63 = vadd.f32 %v295_v61, %v242_v62 }
 0x19a   :  { %v245_v0 = vmax.f32 %v243_v63, 0.0 }
 0x19c   :  { %282 = vmatmul.f32.vlgmr.msra.gmra.mxu2 %v245_v0 }
 0x21f   :  { %v283_v2 = vpop.f32.mrf.mxu2 }
 0x220   :  { %v284_v3 = vadd.f32 %v296_v1, %v283_v2 }
 0x222   :  { %286 = vst [vmem:[%s499_s7] sm:$0xff] %v284_v3 }

</bundles_post_ra>
